<compile_context>
chip_gen: v5e
topology: v5e:2x2
jax: 0.10.0
libtpu: 0.0.40
codegen_flags: <defaults>
</compile_context>

<pallas_src>
import jax
import jax.numpy as jnp
from jax.experimental import pallas as pl
from jax.experimental.pallas import tpu as pltpu


def _identity_kernel(x_ref, o_ref):
    o_ref[...] = x_ref[...]


def _pick_row_tile(rows, cap=512):
    """Row tile: multiple of 8 that divides `rows`, else the full extent."""
    if rows % 8 != 0:
        return rows
    tr = min(rows, cap)
    while rows % tr != 0:
        tr //= 2
    return max(tr, 8)


def _pick_col_tile(cols, cap=512):
    """Col tile: multiple of 128 that divides `cols`, else the full extent."""
    if cols % 128 != 0:
        return cols
    tc = min(cols, cap)
    while cols % tc != 0 or tc % 128 != 0:
        tc //= 2
    return max(tc, 128)


def pallas_identity(x):
    """y = x, as one tiled Pallas copy kernel (works for any shape/dtype)."""
    orig_shape = x.shape
    # Flatten to 2-D (rows, last_dim) so the last dim maps to the lane axis.
    if x.ndim >= 2:
        x2 = x.reshape(-1, orig_shape[-1])
    else:
        x2 = x.reshape(1, -1)
    R, C = x2.shape

    tr = _pick_row_tile(R)
    tc = _pick_col_tile(C)
    grid = (R // tr, C // tc)

    out = pl.pallas_call(
        _identity_kernel,
        out_shape=jax.ShapeDtypeStruct((R, C), x2.dtype),
        grid=grid,
        in_specs=[pl.BlockSpec((tr, tc), lambda i, j: (i, j))],
        out_specs=pl.BlockSpec((tr, tc), lambda i, j: (i, j)),
        compiler_params=pltpu.CompilerParams(
            dimension_semantics=("parallel", "parallel")
        ),
    )(x2)
    return out.reshape(orig_shape)


if __name__ == "__main__":
    key = jax.random.PRNGKey(0)
    k1, k2 = jax.random.split(key)

    # Primary input: lane-dense case (last dim multiple of 128).
    x = jax.random.normal(k1, (8, 256), jnp.float32)
    y = jax.block_until_ready(pallas_identity(x))
    assert y.shape == x.shape and y.dtype == x.dtype
    assert jnp.array_equal(y, x), "identity mismatch (2-D lane-dense case)"

    # Secondary check: 4-D input whose last dim is not a multiple of 128
    # (exercises the full-extent-block fallback path).
    x4 = jax.random.normal(k2, (2, 4, 16, 16), jnp.float32)
    y4 = jax.block_until_ready(pallas_identity(x4))
    assert y4.shape == x4.shape
    assert jnp.array_equal(y4, x4), "identity mismatch (4-D case)"

    print("KERNEL_OK")
</pallas_src>

<mosaic_0001>
module attributes {stable_mosaic.version = 11 : i64} {
  func.func @_identity_kernel(%arg0: i32, %arg1: i32, %arg2: memref<8x256xf32, #tpu.memory_space<vmem>>, %arg3: memref<8x256xf32, #tpu.memory_space<vmem>>) attributes {dimension_semantics = [#tpu.dimension_semantics<parallel>, #tpu.dimension_semantics<parallel>], iteration_bounds = array<i64: 1, 1>, scalar_prefetch = 0 : i64, scratch_operands = 0 : i64, tpu.core_type = #tpu.core_type<tc>, window_params = [{transform_indices = @transform_0, window_bounds = array<i64: 8, 256>}, {transform_indices = @transform_1, window_bounds = array<i64: 8, 256>}]} {
    %c0 = arith.constant 0 : index
    %c0_0 = arith.constant 0 : index
    %0 = vector.load %arg2[%c0, %c0_0] : memref<8x256xf32, #tpu.memory_space<vmem>>, vector<8x256xf32>
    %c0_1 = arith.constant 0 : index
    %c0_2 = arith.constant 0 : index
    %1 = vector.load %arg3[%c0_1, %c0_2] : memref<8x256xf32, #tpu.memory_space<vmem>>, vector<8x256xf32>
    tpu.vector_store %arg3[%c0_1, %c0_2], %0 {strides = array<i32>} : memref<8x256xf32, #tpu.memory_space<vmem>>, vector<8x256xf32>,
    return
  }
  func.func @transform_0(%arg0: i32, %arg1: i32) -> (i32, i32) {
    %c0_i32 = arith.constant 0 : i32
    return %arg0, %arg1 : i32, i32
  }
  func.func @transform_1(%arg0: i32, %arg1: i32) -> (i32, i32) {
    %c0_i32 = arith.constant 0 : i32
    return %arg0, %arg1 : i32, i32
  }
}

</mosaic_0001>

<bundles_post_ra>
// kernel: tpu_custom_call.1
= control target key start
LH: loop header
LB: loop body
LE: loop exit
PB: predicated region body
PF: predicated region fallthrough
CT: control target
= control target key end

     0   :  { %6 = vsyncpa [#allocation3], 0  ;;  %s116_s0 = inlined_call_operand.hbm [shape: f32[8,256], index: 0, kind: input, shape index: {}]   ;;  %s117_s1 = inlined_call_operand.hbm [shape: f32[8,256], index: 1, kind: output, shape index: {}]  }
   0x1   :  { %7 = vsyncpa [#allocation4], 0  ;;  %s13_s8 = sshll.u32 %s116_s0, 4  ;;  %s98_s9 = smov [#allocation2]   ;;  %s14_s8 = int_to_ptr.hbm [resolvable:$true] %s13_s8 }
   0x2   :  { %s15_s10 = sshll.u32 %s98_s9, 4  ;;  %s16_s10 = int_to_ptr.vmem [resolvable:$true] %s15_s10 }
   0x3   :  { %18 = dma.hbm_to_vmem [thread:$0]  %s14_s8, 256, %s16_s10, [#allocation3]  }
   0x4   :  { %94 = dma.done.wait [#allocation3], 256  }
   0x5   :  { %95 = vsyncadd [#allocation3], 4294967040  ;;  %s99_s11 = smov [#allocation5]   ;;  %s34_s15 = sshll.u32 %s117_s1, 4  ;;  %v23_v0 = vld [vmem:[#allocation2] sm:$0xff]  ;;  %v24_v1 = vld [vmem:[#allocation2 + $0x8] sm:$0xff]  ;;  %s35_s15 = int_to_ptr.hbm [resolvable:$true] %s34_s15 }
   0x6   :  { %s32_s12 = sshll.u32 %s99_s11, 4  ;;  %25 = vst [vmem:[#allocation5] sm:$0xff] %v23_v0  ;;  %s33_s12 = int_to_ptr.vmem [resolvable:$true] %s32_s12 }
   0x7   :  { %26 = vst [vmem:[#allocation5 + $0x8] sm:$0xff] %v24_v1 }
   0x8   :  { %37 = dma.vmem_to_hbm [thread:$0]  %s33_s12, 256, %s35_s15, [#allocation4]  }
   0x9   :  { %96 = dma.done.wait [#allocation4], 256  }
   0xa   :  { %97 = vsyncadd [#allocation4], 4294967040 }
   0xb   :  { %42 = vsyncpa [#allocation3], 1 }
   0xc   :  { %43 = vsyncpa [#allocation4], 1 }

</bundles_post_ra>
